<compile_context>
chip_gen: v6e
topology: v6e:2x2x1
jax: 0.10.0
libtpu: 0.0.40
codegen_flags: <defaults>
</compile_context>

<pallas_src>
import functools

import jax
import jax.numpy as jnp
from jax.experimental import pallas as pl
from jax.experimental.pallas import tpu as pltpu

_SUBLANE = 8
_MAX_TM = 512      # max rows per batch tile (review: 256 -> 512 pipeline eff.)
_SMALL_TM = 256    # below this, a single exact tile (no batch padding)


def _round_up(x, m):
    return ((x + m - 1) // m) * m


def _cdiv(a, b):
    return (a + b - 1) // b


def _physical_vmem_bytes():
    """Per-core VMEM capacity; conservative 64 MiB (v7x) fallback."""
    try:
        info = pltpu.get_tpu_info()
        v = int(getattr(info, "vmem_capacity_bytes", 0) or 0)
        if v > 0:
            return v
    except Exception:
        pass
    return 64 * 1024 * 1024


# ---------------------------------------------------------------------------
# Kernel: fused MLP forward for one (tm, K) batch tile.
# refs = (x_ref, w0_ref, b0_ref, ..., w_{L-1}_ref, b_{L-1}_ref, o_ref)
# Hidden weights are (in_features, out_features) in the compute dtype; biases
# are (1, out_features) f32.  If last_vpu, the final weight is the (1, n_dim)
# row of the (n_dim -> 1) layer and is applied on the VPU/XLU (no MXU pass,
# no 128-lane output padding).
# ---------------------------------------------------------------------------
def _fused_mlp_kernel(*refs, n_layers, last_vpu):
    x_ref = refs[0]
    o_ref = refs[-1]
    wb = refs[1:-1]

    h = x_ref[...]                                      # (tm, K), compute dtype
    for l in range(n_layers):
        w_ref, b_ref = wb[2 * l], wb[2 * l + 1]
        b = b_ref[...].astype(jnp.float32)
        if last_vpu and l == n_layers - 1:
            # (n_dim -> 1): VPU broadcast-multiply + XLU last-axis reduce.
            w_row = w_ref[...].astype(jnp.float32)      # (1, n_dim)
            h = jnp.sum(h.astype(jnp.float32) * w_row, axis=-1, keepdims=True) + b
        else:
            w = w_ref[...]                              # (in, out)
            h = jnp.dot(h.astype(w.dtype), w,
                        preferred_element_type=jnp.float32) + b
    o_ref[...] = h.astype(o_ref.dtype)


# ---------------------------------------------------------------------------
# Specs / sizing helpers
# ---------------------------------------------------------------------------
def _invariant_spec(shape):
    """Fully-resident (grid-invariant) VMEM input; single-buffered."""
    ndim = len(shape)
    index_map = lambda i: (0,) * ndim
    try:
        return pl.BlockSpec(shape, index_map, pipeline_mode=pl.Buffered(1))
    except TypeError:  # older JAX without pipeline_mode: default double-buffer
        return pl.BlockSpec(shape, index_map)


def _estimate_vmem_bytes(tm, K, layers, x_itemsize, n_out):
    # Weights/biases are invariant + single-buffered -> counted once.
    weights = sum(w.size * w.dtype.itemsize + b.size * b.dtype.itemsize
                  for w, b in layers)
    x_tile = 2 * tm * K * x_itemsize                 # double-buffered x tile
    o_tile = 2 * tm * max(n_out, 1) * 4              # double-buffered f32 out tile
    widest = max([K] + [w.shape[-1] for w, _ in layers])
    act = 2 * tm * widest * 4                        # live f32 activations (slack)
    return weights + x_tile + o_tile + act


def _pick_tiling(M, K, layers, x_itemsize, n_out, vmem_budget, tm=None):
    m8 = _round_up(max(M, 1), _SUBLANE)
    if tm is not None:
        tm = max(_SUBLANE, _round_up(min(tm, m8), _SUBLANE))
        n_tiles = _cdiv(m8, tm)
    elif m8 <= _SMALL_TM:
        tm, n_tiles = m8, 1                          # single exact tile, no padding
    else:
        # >=2 balanced tiles (v7x megacore can shard the batch axis), capped at
        # _MAX_TM rows; padding waste stays < n_tiles * 8 rows.
        n_tiles = max(2, _cdiv(m8, _MAX_TM))
        tm = _round_up(_cdiv(m8, n_tiles), _SUBLANE)
    # Shrink the tile if resident weights + tiles exceed the VMEM budget.
    while tm > 2 * _SUBLANE and _estimate_vmem_bytes(
            tm, K, layers, x_itemsize, n_out) > vmem_budget:
        tm = _round_up(tm // 2, _SUBLANE)
        n_tiles = _cdiv(m8, tm)
    # TODO(synk): add a K/N-tiled weight path (reduction axis last in the grid,
    # "arbitrary", f32 scratch accumulator with pl.when init/finalize) for
    # n_dim large enough that resident weights no longer fit VMEM (first
    # breaks on v7x's 64 MiB).
    return tm, n_tiles


# ---------------------------------------------------------------------------
# pallas_call wrapper
# ---------------------------------------------------------------------------
def _pallas_fused_mlp(x, layers, tm, n_tiles, last_vpu, n_out, vmem_limit):
    m_pad, K = x.shape
    flat_inputs = [x]
    in_specs = [pl.BlockSpec((tm, K), lambda i: (i, 0))]       # batch tile
    for w, b in layers:
        flat_inputs += [w, b]
        in_specs.append(_invariant_spec(w.shape))              # resident W
        in_specs.append(_invariant_spec(b.shape))              # resident b

    kernel = functools.partial(_fused_mlp_kernel, n_layers=len(layers),
                               last_vpu=last_vpu)
    return pl.pallas_call(
        kernel,
        out_shape=jax.ShapeDtypeStruct((m_pad, n_out), jnp.float32),
        grid_spec=pltpu.PrefetchScalarGridSpec(
            num_scalar_prefetch=0,
            grid=(n_tiles,),
            in_specs=in_specs,
            out_specs=pl.BlockSpec((tm, n_out), lambda i: (i, 0)),
        ),
        compiler_params=pltpu.CompilerParams(
            dimension_semantics=("parallel",),
            vmem_limit_bytes=vmem_limit,
        ),
    )(*flat_inputs)


@functools.partial(
    jax.jit,
    static_argnames=("tm", "n_tiles", "last_vpu", "n_out", "vmem_limit"))
def _forward_jit(x, layers, *, tm, n_tiles, last_vpu, n_out, vmem_limit):
    M = x.shape[0]
    m_pad = tm * n_tiles
    compute_dtype = layers[0][0].dtype
    # Cast x to the compute dtype OUTSIDE the kernel (halves the dominant
    # input DMA stream for bf16), then pad the batch to the tiled extent.
    x_in = x.astype(compute_dtype)
    if m_pad != M:
        x_in = jnp.pad(x_in, ((0, m_pad - M), (0, 0)))
    out = _pallas_fused_mlp(x_in, layers, tm, n_tiles, last_vpu, n_out,
                            vmem_limit)
    return out[:M]


# ---------------------------------------------------------------------------
# Parameter handling (PyTorch nn.Linear layout: W is (out_features, in_features))
# ---------------------------------------------------------------------------
def init_mlp_params(key, n_features, n_dim, n_layers, dtype=jnp.float32):
    """PyTorch-like init: U(-1/sqrt(fan_in), 1/sqrt(fan_in))."""
    dims_in = [n_features] + [n_dim] * (n_layers - 1)
    dims_out = [n_dim] * (n_layers - 1) + [1]
    params = []
    for d_in, d_out in zip(dims_in, dims_out):
        key, kw, kb = jax.random.split(key, 3)
        bound = float(d_in) ** -0.5
        W = jax.random.uniform(kw, (d_out, d_in), dtype, -bound, bound)
        b = jax.random.uniform(kb, (d_out,), dtype, -bound, bound)
        params.append((W, b))
    return params


def prepare_mlp_params(params, compute_dtype=jnp.bfloat16):
    """One-time prep: transpose hidden weights and cast to the compute dtype
    (default bf16 — native MXU dtype on all gens; accumulation stays f32).
    The final (n_dim -> 1) weight is kept as a (1, n_dim) row for the
    in-kernel VPU path.  Biases stay f32 (added on the VPU in f32)."""
    n = len(params)
    last_vpu = bool(params[-1][0].shape[0] == 1)
    layers = []
    for i, (W, b) in enumerate(params):
        if last_vpu and i == n - 1:
            w = jnp.asarray(W, compute_dtype)            # (1, n_dim) VPU row
        else:
            w = jnp.asarray(W, compute_dtype).T          # (in, out) for the MXU
        layers.append((w, jnp.asarray(b, jnp.float32).reshape(1, -1)))
    return {"layers": layers, "last_vpu": last_vpu,
            "n_out": int(params[-1][0].shape[0])}


def mlp_nn_forward(x, params=None, *, prepared=None, tm=None,
                   compute_dtype=jnp.bfloat16):
    """Forward pass of MLP_NN: x -> Linear -> ... -> Linear(n_dim, 1)."""
    if prepared is None:
        if params is None:
            raise ValueError("pass either params or prepared")
        prepared = prepare_mlp_params(params, compute_dtype)
    layers = prepared["layers"]
    last_vpu = prepared["last_vpu"]
    n_out = prepared["n_out"]

    M, K = x.shape
    x_itemsize = jnp.dtype(layers[0][0].dtype).itemsize
    phys = _physical_vmem_bytes()
    budget = int(phys * 0.85)
    tm, n_tiles = _pick_tiling(M, K, layers, x_itemsize, n_out, budget, tm=tm)
    est = _estimate_vmem_bytes(tm, K, layers, x_itemsize, n_out)
    # Always set an explicit scoped-VMEM limit (v5e default is only 16 MiB),
    # clamped below physical capacity (v7x: 64 MiB).
    vmem_limit = min(int(phys * 0.9),
                     max(32 * 1024 * 1024, int(est * 1.25) + (1 << 20)))
    return _forward_jit(x, layers, tm=tm, n_tiles=n_tiles, last_vpu=last_vpu,
                        n_out=n_out, vmem_limit=vmem_limit)


# ---------------------------------------------------------------------------
# References
# ---------------------------------------------------------------------------
def mlp_nn_reference(x, params):
    """Exact f32 chain matching PyTorch MLP_NN semantics."""
    h = jnp.asarray(x, jnp.float32)
    for W, b in params:
        h = jnp.dot(h, jnp.asarray(W, jnp.float32).T,
                    preferred_element_type=jnp.float32) + jnp.asarray(b, jnp.float32)
    return h


def mlp_nn_reference_prepared(x, prepared):
    """Plain-jnp mirror of the kernel math (same casts / last-layer reduce)."""
    layers, last_vpu = prepared["layers"], prepared["last_vpu"]
    n = len(layers)
    h = jnp.asarray(x, layers[0][0].dtype)
    for i, (w, b) in enumerate(layers):
        if last_vpu and i == n - 1:
            h = jnp.sum(h.astype(jnp.float32) * w.astype(jnp.float32),
                        axis=-1, keepdims=True) + b
        else:
            h = jnp.dot(h.astype(w.dtype), w,
                        preferred_element_type=jnp.float32) + b
    return h


if __name__ == "__main__":
    # Small shapes consistent with MLP_NN(n_features, n_dim, n_layers=4):
    # 160 -> 128 -> 128 -> 128 -> 1, batch = 16.
    batch, n_features, n_dim, n_layers = 16, 160, 128, 4

    key = jax.random.PRNGKey(0)
    key, kx = jax.random.split(key)
    x = jax.random.normal(kx, (batch, n_features), jnp.float32)
    params = init_mlp_params(key, n_features, n_dim, n_layers)
    ref = mlp_nn_reference(x, params)

    # Default bf16-weight path (f32 MXU accumulation) — native on all gens.
    prepared_bf16 = prepare_mlp_params(params)
    out_bf16 = jax.block_until_ready(mlp_nn_forward(x, prepared=prepared_bf16))
    assert out_bf16.shape == (batch, 1), out_bf16.shape
    ref_bf16 = mlp_nn_reference_prepared(x, prepared_bf16)
    assert jnp.allclose(out_bf16, ref_bf16, atol=2e-3, rtol=2e-3), (
        float(jnp.max(jnp.abs(out_bf16 - ref_bf16))))
    # bf16 weights drift from the f32 module only by bf16 quantization.
    assert jnp.allclose(out_bf16, ref, atol=5e-2, rtol=5e-2), (
        float(jnp.max(jnp.abs(out_bf16 - ref))))

    # Exact f32 path.
    prepared_f32 = prepare_mlp_params(params, compute_dtype=jnp.float32)
    out_f32 = jax.block_until_ready(mlp_nn_forward(x, prepared=prepared_f32))
    assert out_f32.shape == (batch, 1), out_f32.shape
    assert jnp.allclose(out_f32, ref, atol=1e-4, rtol=1e-4), (
        float(jnp.max(jnp.abs(out_f32 - ref))))

    # Ragged batch (not a multiple of 8) exercises the pad/slice path.
    x_odd = jax.random.normal(key, (13, n_features), jnp.float32)
    out_odd = jax.block_until_ready(mlp_nn_forward(x_odd, prepared=prepared_f32))
    ref_odd = mlp_nn_reference(x_odd, params)
    assert out_odd.shape == (13, 1), out_odd.shape
    assert jnp.allclose(out_odd, ref_odd, atol=1e-4, rtol=1e-4), (
        float(jnp.max(jnp.abs(out_odd - ref_odd))))

    # Larger batch exercises the multi-tile (>=2 grid steps, megacore) path.
    x_big = jax.random.normal(kx, (600, n_features), jnp.float32)
    out_big = jax.block_until_ready(mlp_nn_forward(x_big, prepared=prepared_bf16))
    ref_big = mlp_nn_reference_prepared(x_big, prepared_bf16)
    assert out_big.shape == (600, 1), out_big.shape
    assert jnp.allclose(out_big, ref_big, atol=2e-3, rtol=2e-3), (
        float(jnp.max(jnp.abs(out_big - ref_big))))

    print("KERNEL_OK")
</pallas_src>

<mosaic_0001>
module attributes {stable_mosaic.version = 11 : i64} {
  func.func @_fused_mlp_kernel(%arg0: i32, %arg1: memref<16x160xbf16, #tpu.memory_space<vmem>>, %arg2: memref<160x128xbf16, #tpu.memory_space<vmem>>, %arg3: memref<1x128xf32, #tpu.memory_space<vmem>>, %arg4: memref<128x128xbf16, #tpu.memory_space<vmem>>, %arg5: memref<1x128xf32, #tpu.memory_space<vmem>>, %arg6: memref<128x128xbf16, #tpu.memory_space<vmem>>, %arg7: memref<1x128xf32, #tpu.memory_space<vmem>>, %arg8: memref<1x128xbf16, #tpu.memory_space<vmem>>, %arg9: memref<1x1xf32, #tpu.memory_space<vmem>>, %arg10: memref<16x1xf32, #tpu.memory_space<vmem>>) attributes {dimension_semantics = [#tpu.dimension_semantics<parallel>], iteration_bounds = array<i64: 1>, scalar_prefetch = 0 : i64, scratch_operands = 0 : i64, tpu.core_type = #tpu.core_type<tc>, window_params = [{transform_indices = @transform_0, window_bounds = array<i64: 16, 160>}, {pipeline_mode = #tpu.pipeline_mode<synchronous>, transform_indices = @transform_1, window_bounds = array<i64: 160, 128>}, {pipeline_mode = #tpu.pipeline_mode<synchronous>, transform_indices = @transform_2, window_bounds = array<i64: 1, 128>}, {pipeline_mode = #tpu.pipeline_mode<synchronous>, transform_indices = @transform_3, window_bounds = array<i64: 128, 128>}, {pipeline_mode = #tpu.pipeline_mode<synchronous>, transform_indices = @transform_4, window_bounds = array<i64: 1, 128>}, {pipeline_mode = #tpu.pipeline_mode<synchronous>, transform_indices = @transform_5, window_bounds = array<i64: 128, 128>}, {pipeline_mode = #tpu.pipeline_mode<synchronous>, transform_indices = @transform_6, window_bounds = array<i64: 1, 128>}, {pipeline_mode = #tpu.pipeline_mode<synchronous>, transform_indices = @transform_7, window_bounds = array<i64: 1, 128>}, {pipeline_mode = #tpu.pipeline_mode<synchronous>, transform_indices = @transform_8, window_bounds = array<i64: 1, 1>}, {transform_indices = @transform_9, window_bounds = array<i64: 16, 1>}]} {
    %c0 = arith.constant 0 : index
    %c0_0 = arith.constant 0 : index
    %0 = vector.load %arg1[%c0, %c0_0] : memref<16x160xbf16, #tpu.memory_space<vmem>>, vector<16x160xbf16>
    %c0_1 = arith.constant 0 : index
    %c0_2 = arith.constant 0 : index
    %1 = vector.load %arg3[%c0_1, %c0_2] : memref<1x128xf32, #tpu.memory_space<vmem>>, vector<1x128xf32>
    %c0_3 = arith.constant 0 : index
    %c0_4 = arith.constant 0 : index
    %2 = vector.load %arg2[%c0_3, %c0_4] : memref<160x128xbf16, #tpu.memory_space<vmem>>, vector<160x128xbf16>
    %cst = arith.constant dense<0.000000e+00> : vector<16x128xf32>
    %3 = tpu.matmul %0, %2, %cst {dimension_numbers = #tpu.dot_dimension_numbers<[1], [0], [0], [1], [0, 0, 1, 1], [], []>} : vector<16x160xbf16>, vector<160x128xbf16>, vector<16x128xf32> -> vector<16x128xf32>
    %4 = vector.broadcast %1 : vector<1x128xf32> to vector<16x128xf32>
    %5 = arith.addf %3, %4 : vector<16x128xf32>
    %c0_5 = arith.constant 0 : index
    %c0_6 = arith.constant 0 : index
    %6 = vector.load %arg5[%c0_5, %c0_6] : memref<1x128xf32, #tpu.memory_space<vmem>>, vector<1x128xf32>
    %c0_7 = arith.constant 0 : index
    %c0_8 = arith.constant 0 : index
    %7 = vector.load %arg4[%c0_7, %c0_8] : memref<128x128xbf16, #tpu.memory_space<vmem>>, vector<128x128xbf16>
    %8 = arith.truncf %5 : vector<16x128xf32> to vector<16x128xbf16>
    %cst_9 = arith.constant dense<0.000000e+00> : vector<16x128xf32>
    %9 = tpu.matmul %8, %7, %cst_9 {dimension_numbers = #tpu.dot_dimension_numbers<[1], [0], [0], [1], [0, 0, 1, 1], [], []>} : vector<16x128xbf16>, vector<128x128xbf16>, vector<16x128xf32> -> vector<16x128xf32>
    %10 = vector.broadcast %6 : vector<1x128xf32> to vector<16x128xf32>
    %11 = arith.addf %9, %10 : vector<16x128xf32>
    %c0_10 = arith.constant 0 : index
    %c0_11 = arith.constant 0 : index
    %12 = vector.load %arg7[%c0_10, %c0_11] : memref<1x128xf32, #tpu.memory_space<vmem>>, vector<1x128xf32>
    %c0_12 = arith.constant 0 : index
    %c0_13 = arith.constant 0 : index
    %13 = vector.load %arg6[%c0_12, %c0_13] : memref<128x128xbf16, #tpu.memory_space<vmem>>, vector<128x128xbf16>
    %14 = arith.truncf %11 : vector<16x128xf32> to vector<16x128xbf16>
    %cst_14 = arith.constant dense<0.000000e+00> : vector<16x128xf32>
    %15 = tpu.matmul %14, %13, %cst_14 {dimension_numbers = #tpu.dot_dimension_numbers<[1], [0], [0], [1], [0, 0, 1, 1], [], []>} : vector<16x128xbf16>, vector<128x128xbf16>, vector<16x128xf32> -> vector<16x128xf32>
    %16 = vector.broadcast %12 : vector<1x128xf32> to vector<16x128xf32>
    %17 = arith.addf %15, %16 : vector<16x128xf32>
    %c0_15 = arith.constant 0 : index
    %c0_16 = arith.constant 0 : index
    %18 = vector.load %arg9[%c0_15, %c0_16] : memref<1x1xf32, #tpu.memory_space<vmem>>, vector<1x1xf32>
    %c0_17 = arith.constant 0 : index
    %c0_18 = arith.constant 0 : index
    %19 = vector.load %arg8[%c0_17, %c0_18] : memref<1x128xbf16, #tpu.memory_space<vmem>>, vector<1x128xbf16>
    %20 = arith.extf %19 : vector<1x128xbf16> to vector<1x128xf32>
    %21 = vector.broadcast %20 : vector<1x128xf32> to vector<16x128xf32>
    %22 = arith.mulf %17, %21 : vector<16x128xf32>
    %cst_19 = arith.constant dense<0.000000e+00> : vector<16xf32>
    %23 = vector.multi_reduction <add>, %22, %cst_19 [1] : vector<16x128xf32> to vector<16xf32>
    %24 = vector.shape_cast %23 : vector<16xf32> to vector<16x1xf32>
    %25 = vector.broadcast %18 : vector<1x1xf32> to vector<16x1xf32>
    %26 = arith.addf %24, %25 : vector<16x1xf32>
    %c0_20 = arith.constant 0 : index
    %c0_21 = arith.constant 0 : index
    %27 = vector.load %arg10[%c0_20, %c0_21] : memref<16x1xf32, #tpu.memory_space<vmem>>, vector<16x1xf32>
    tpu.vector_store %arg10[%c0_20, %c0_21], %26 {strides = array<i32>} : memref<16x1xf32, #tpu.memory_space<vmem>>, vector<16x1xf32>,
    return
  }
  func.func @transform_0(%arg0: i32) -> (i32, i32) {
    %c0_i32 = arith.constant 0 : i32
    %c0_i32_0 = arith.constant 0 : i32
    return %arg0, %c0_i32 : i32, i32
  }
  func.func @transform_1(%arg0: i32) -> (i32, i32) {
    %c0_i32 = arith.constant 0 : i32
    %c0_i32_0 = arith.constant 0 : i32
    %c0_i32_1 = arith.constant 0 : i32
    return %c0_i32, %c0_i32_0 : i32, i32
  }
  func.func @transform_2(%arg0: i32) -> (i32, i32) {
    %c0_i32 = arith.constant 0 : i32
    %c0_i32_0 = arith.constant 0 : i32
    %c0_i32_1 = arith.constant 0 : i32
    return %c0_i32, %c0_i32_0 : i32, i32
  }
  func.func @transform_3(%arg0: i32) -> (i32, i32) {
    %c0_i32 = arith.constant 0 : i32
    %c0_i32_0 = arith.constant 0 : i32
    %c0_i32_1 = arith.constant 0 : i32
    return %c0_i32, %c0_i32_0 : i32, i32
  }
  func.func @transform_4(%arg0: i32) -> (i32, i32) {
    %c0_i32 = arith.constant 0 : i32
    %c0_i32_0 = arith.constant 0 : i32
    %c0_i32_1 = arith.constant 0 : i32
    return %c0_i32, %c0_i32_0 : i32, i32
  }
  func.func @transform_5(%arg0: i32) -> (i32, i32) {
    %c0_i32 = arith.constant 0 : i32
    %c0_i32_0 = arith.constant 0 : i32
    %c0_i32_1 = arith.constant 0 : i32
    return %c0_i32, %c0_i32_0 : i32, i32
  }
  func.func @transform_6(%arg0: i32) -> (i32, i32) {
    %c0_i32 = arith.constant 0 : i32
    %c0_i32_0 = arith.constant 0 : i32
    %c0_i32_1 = arith.constant 0 : i32
    return %c0_i32, %c0_i32_0 : i32, i32
  }
  func.func @transform_7(%arg0: i32) -> (i32, i32) {
    %c0_i32 = arith.constant 0 : i32
    %c0_i32_0 = arith.constant 0 : i32
    %c0_i32_1 = arith.constant 0 : i32
    return %c0_i32, %c0_i32_0 : i32, i32
  }
  func.func @transform_8(%arg0: i32) -> (i32, i32) {
    %c0_i32 = arith.constant 0 : i32
    %c0_i32_0 = arith.constant 0 : i32
    %c0_i32_1 = arith.constant 0 : i32
    return %c0_i32, %c0_i32_0 : i32, i32
  }
  func.func @transform_9(%arg0: i32) -> (i32, i32) {
    %c0_i32 = arith.constant 0 : i32
    %c0_i32_0 = arith.constant 0 : i32
    return %arg0, %c0_i32 : i32, i32
  }
}

</mosaic_0001>

<bundles_post_ra>
// kernel: _forward_jit.1
= control target key start
LH: loop header
LB: loop body
LE: loop exit
PB: predicated region body
PF: predicated region fallthrough
CT: control target
= control target key end

     0   :  { %s779_s0 = inlined_call_operand.vmem [shape: bf16[16,160], index: 0, kind: input, shape index: {}]   ;;  %s780_s1 = inlined_call_operand.hbm [shape: bf16[160,128], index: 1, kind: input, shape index: {}]   ;;  %s781_s2 = inlined_call_operand.vmem [shape: f32[1,128], index: 2, kind: input, shape index: {}]   ;;  %s782_s3 = inlined_call_operand.hbm [shape: bf16[128,128], index: 3, kind: input, shape index: {}]   ;;  %s783_s4 = inlined_call_operand.vmem [shape: f32[1,128], index: 4, kind: input, shape index: {}]   ;;  %s784_s5 = inlined_call_operand.hbm [shape: bf16[128,128], index: 5, kind: input, shape index: {}]   ;;  %s785_s6 = inlined_call_operand.vmem [shape: f32[1,128], index: 6, kind: input, shape index: {}]   ;;  %s786_s7 = inlined_call_operand.vmem [shape: bf16[1,128], index: 7, kind: input, shape index: {}]   ;;  %s787_s8 = inlined_call_operand.<no memory space> [shape: f32[1,1], index: 8, kind: input, shape index: {}]   ;;  %s788_s9 = inlined_call_operand.vmem [shape: f32[16,1], index: 9, kind: output, shape index: {}]  }
   0x1   :  { %v14_v0 = vstv %s787_s8 }
   0x2   :  { %15 = vst [vmem:[#allocation2] sm:$0x1] %v14_v0 }
   0x3   :  { %16 = vsyncpa [#allocation4], 0 }
   0x4   :  { %17 = vsyncpa [#allocation6], 0  ;;  %s667_s11 = smov [#allocation5]   ;;  %s668_s13 = smov [#allocation3]  }
   0x5   :  { %s39_s12 = sshll.u32 %s667_s11, 4  ;;  %s25_s14 = sshll.u32 %s668_s13, 4  ;;  %s40_s12 = int_to_ptr.vmem [resolvable:$true] %s39_s12  ;;  %s26_s14 = int_to_ptr.vmem [resolvable:$true] %s25_s14 }
   0x6   :  { %s611_s15 = scalar_lea.vmem %s40_s12, 1024  ;;  %p616_p1 = scmp.lt.s32.totalorder %s40_s12, %s40_s12 }
   0x7   :  { %p612_p0 = scmp.ne.s32.totalorder %s40_s12, %s611_s15  ;;  %p617_p2 = scmp.lt.s32.totalorder %s611_s15, %s611_s15 }
   0x9   :  { %p618_p3 = por %p617_p2, %p616_p1 }
   0xb   :  { %p619_p4 = pnand %p618_p3, %p612_p0 }
   0xd   :  { %622 = shalt.err (!%p619_p4)
}
   0xe   :  { %s669_s16 = smov 64   ;;  %s670_s17 = smov 4  }
   0xf   :  { %45 = dma.hbm_to_vmem [thread:$0]  %s782_s3, 1024, %s40_s12, [#allocation6], %s669_s16, %s669_s16, %s670_s17  }
  0x10   :  { %s631_s19 = scalar_lea.vmem %s26_s14, 1280  ;;  %p636_p6 = scmp.lt.s32.totalorder %s26_s14, %s26_s14 }
  0x11   :  { %p632_p5 = scmp.ne.s32.totalorder %s26_s14, %s631_s19  ;;  %p637_p7 = scmp.lt.s32.totalorder %s631_s19, %s631_s19 }
  0x13   :  { %p638_p8 = por %p637_p7, %p636_p6 }
  0x15   :  { %p639_p9 = pnand %p638_p8, %p632_p5 }
  0x17   :  { %642 = shalt.err (!%p639_p9)
}
  0x18   :  { %31 = dma.hbm_to_vmem [thread:$0]  %s780_s1, 1280, %s26_s14, [#allocation4], %s669_s16, %s669_s16, %s670_s17  }
  0x19   :  { %s671_s22 = smov [#allocation7]  }
  0x1a   :  { %s53_s23 = sshll.u32 %s671_s22, 4  ;;  %s54_s23 = int_to_ptr.vmem [resolvable:$true] %s53_s23 }
  0x1b   :  { %s651_s24 = scalar_lea.vmem %s54_s23, 1024  ;;  %p656_p11 = scmp.lt.s32.totalorder %s54_s23, %s54_s23 }
  0x1c   :  { %p652_p10 = scmp.ne.s32.totalorder %s54_s23, %s651_s24  ;;  %p657_p12 = scmp.lt.s32.totalorder %s651_s24, %s651_s24 }
  0x1e   :  { %p658_p13 = por %p657_p12, %p656_p11 }
  0x20   :  { %p659_p0 = pnand %p658_p13, %p652_p10 }
  0x22   :  { %662 = shalt.err (!%p659_p0)
}
  0x23   :  { %59 = dma.hbm_to_vmem [thread:$0]  %s784_s5, 1024, %s54_s23, [#allocation6], %s669_s16, %s669_s16, %s670_s17  }
  0x24   :  { %663 = dma.done.wait [#allocation4], 1280  }
  0x25   :  { %664 = vsyncadd [#allocation4], 4294966016 }
  0x26   :  { %665 = dma.done.wait [#allocation6], 2048  }
  0x27   :  { %666 = vsyncadd [#allocation6], 4294965248  ;;  %v672_v1 = vmov 0   ;;  %v673_v2 = vmov 0.0   ;;  %v574_v3 = vld [vmem:[#allocation3 + $0x38] sm:$0xff]   ;;  %v575_v4 = vld [vmem:[#allocation3 + $0x30] sm:$0xff]   ;;  %v448_v47 = vlaneseq }
  0x28   :  { %178 = vmatprep.subr.bf16.mxu0 %v672_v1  ;;  %526 = vmatprep.subr.bf16.mxu1 %v673_v2  ;;  %v576_v5 = vld [vmem:[#allocation3 + $0x28] sm:$0xff]   ;;  %v577_v6 = vld [vmem:[#allocation3 + $0x20] sm:$0xff]   ;;  %vm174_vm0 = vcmask 261120   ;;  %v578_v9 = vld [vmem:[#allocation3 + $0x18] sm:$0xff]   ;;  %vm674_vm1 = vmmov 0   ;;  %vm466_vm2 = vcmask 7168  }
  0x29   :  { %179 = vmatpush1.bf16.msra.mxu0 %v574_v3  ;;  %v586_v7 = vld [vmem:[%s779_s0 + $0x4] ss:$8 sps:$4 sm:$0xff]   ;;  %v579_v11 = vld [vmem:[#allocation3 + $0x10] sm:$0xff]   ;;  %v589_v12 = vld [vmem:[#allocation5 + $0x28] sm:$0xff]   ;;  %542 = vmatprep.mubr.msk.bf16.mxu1 %vm674_vm1, %v673_v2  ;;  %v449_v48 = vshrl.u32 %v448_v47, 7 }
  0x2a   :  { %180 = vmatprep.subr.bf16.mxu0 %v672_v1  ;;  %v587_v8 = vld [vmem:[#allocation5 + $0x38] sm:$0xff]   ;;  %488 = vmatprep.mubr.msk.bf16.mxu0 %vm174_vm0, %v586_v7  ;;  %v588_v10 = vld [vmem:[#allocation5 + $0x30] sm:$0xff]   ;;  %v590_v14 = vld [vmem:[#allocation5 + $0x20] sm:$0xff]  }
  0x2b   :  { %527 = vmatpush3.bf16.msra.mxu1 %v587_v8  ;;  %v580_v13 = vld [vmem:[#allocation3 + $0x8] sm:$0xff]   ;;  %v581_v15 = vld [vmem:[#allocation3] sm:$0xff]   ;;  %v593_v21 = vld [vmem:[#allocation5 + $0x8] sm:$0xff]   ;;  %v450_v51 = vsub.s32 0, %v449_v48 }
  0x2c   :  { %528 = vmatprep.subr.bf16.mxu1 %v673_v2  ;;  %v591_v16 = vld [vmem:[#allocation5 + $0x18] sm:$0xff]   ;;  %v592_v18 = vld [vmem:[#allocation5 + $0x10] sm:$0xff]   ;;  %v594_v22 = vld [vmem:[#allocation5] sm:$0xff]  }
  0x2d   :  { %181 = vmatpush1.bf16.msra.mxu0 %v575_v4  ;;  %v582_v17 = vld [vmem:[#allocation3 + $0x48] sm:$0xff]   ;;  %v583_v19 = vld [vmem:[#allocation3 + $0x40] sm:$0xff]   ;;  %v475_v24 = vld [vmem:[%s781_s2] ss:$0 sm:$0xff] }
  0x2e   :  { %182 = vmatprep.subr.bf16.mxu0 %v672_v1  ;;  %v584_v20 = vld [vmem:[%s779_s0] ss:$8 sps:$4 sm:$0xff]   ;;  %v598_v34 = vld [vmem:[#allocation7 + $0x20] sm:$0xff]  }
  0x2f   :  { %529 = vmatpush3.bf16.msra.mxu1 %v588_v10  ;;  %v595_v30 = vld [vmem:[#allocation7 + $0x38] sm:$0xff]   ;;  %v596_v32 = vld [vmem:[#allocation7 + $0x30] sm:$0xff]   ;;  %v597_v33 = vld [vmem:[#allocation7 + $0x28] sm:$0xff]  }
  0x30   :  { %530 = vmatprep.subr.bf16.mxu1 %v673_v2  ;;  %v599_v35 = vld [vmem:[#allocation7 + $0x18] sm:$0xff]   ;;  %v600_v36 = vld [vmem:[#allocation7 + $0x10] sm:$0xff]   ;;  %v601_v37 = vld [vmem:[#allocation7 + $0x8] sm:$0xff]  }
  0x31   :  { %183 = vmatpush1.bf16.msra.mxu0 %v576_v5  ;;  %v602_v38 = vld [vmem:[#allocation7] sm:$0xff]   ;;  %v489_v40 = vld [vmem:[%s783_s4] ss:$0 sm:$0xff] }
  0x32   :  { %184 = vmatprep.subr.bf16.mxu0 %v672_v1  ;;  %v446_v49 = vld [vmem:[%s786_s7] sm:$0x1] }
  0x33   :  { %531 = vmatpush3.bf16.msra.mxu1 %v589_v12  ;;  %v447_v50 = vunpack.c.l.bf16 %v446_v49  ;;  %v498_v52 = vld [vmem:[%s785_s6] ss:$0 sm:$0xff] }
  0x34   :  { %532 = vmatprep.subr.bf16.mxu1 %v673_v2  ;;  %v507_v62 = vld [vmem:[#allocation2] ss:$0 sm:$0xff] }
  0x35   :  { %185 = vmatpush1.bf16.msra.mxu0 %v577_v6  ;;  %v451_v53 = vrot.slane %v447_v50, %v450_v51 }
  0x36   :  { %186 = vmatprep.subr.bf16.mxu0 %v672_v1 }
  0x37   :  { %533 = vmatpush3.bf16.msra.mxu1 %v590_v14 }
  0x38   :  { %534 = vmatprep.subr.bf16.mxu1 %v673_v2 }
  0x39   :  { %187 = vmatpush1.bf16.msra.mxu0 %v578_v9 }
  0x3a   :  { %188 = vmatprep.subr.bf16.mxu0 %v672_v1 }
  0x3b   :  { %535 = vmatpush3.bf16.msra.mxu1 %v591_v16 }
  0x3c   :  { %536 = vmatprep.subr.bf16.mxu1 %v673_v2 }
  0x3d   :  { %189 = vmatpush1.bf16.msra.mxu0 %v579_v11 }
  0x3e   :  { %190 = vmatprep.subr.bf16.mxu0 %v672_v1 }
  0x3f   :  { %537 = vmatpush3.bf16.msra.mxu1 %v592_v18 }
  0x40   :  { %538 = vmatprep.subr.bf16.mxu1 %v673_v2 }
  0x41   :  { %191 = vmatpush1.bf16.msra.mxu0 %v580_v13 }
  0x42   :  { %192 = vmatprep.subr.bf16.mxu0 %v672_v1 }
  0x43   :  { %539 = vmatpush3.bf16.msra.mxu1 %v593_v21 }
  0x44   :  { %540 = vmatprep.subr.bf16.mxu1 %v673_v2 }
  0x45   :  { %193 = vmatpush1.bf16.msra.mxu0 %v581_v15 }
  0x46   :  { %206 = vmatprep.subr.bf16.mxu0 %v672_v1 }
  0x47   :  { %541 = vmatpush3.bf16.msra.mxu1 %v594_v22 }
  0x48   :  { %546 = vmatprep.subr.bf16.mxu1 %v673_v2 }
  0x49   :  { %207 = vmatpush2.bf16.msra.mxu0 %v582_v17 }
  0x4a   :  { %208 = vmatprep.subr.bf16.mxu0 %v672_v1 }
  0x4d   :  { %209 = vmatpush2.bf16.msra.mxu0 %v583_v19 }
  0x50   :  { %211 = vmatmul.mubr.bf16.vlgmr.msra.gmra.mxu0 %v584_v20 }
 0x110   :  { %v212_v23 = vpop.f32.mrf.mxu0 }
 0x111   :  { %v213_v27 = vadd.f32 %v475_v24, %v212_v23 }
 0x112   :  { %v214_v25 = vpop.f32.mrf.mxu0 }
 0x114   :  { %v215_v26 = vpop.f32.mrf.mxu0 }
 0x115   :  { %v216_v28 = vadd.f32 %v475_v24, %v215_v26 }
 0x116   :  { %v217_v29 = vpop.f32.mrf.mxu0 }
 0x117   :  { %v236_v31 = vpack.c.bf16 %v216_v28, %v213_v27 }
 0x119   :  { %543 = vmatmul.mubr.bf16.vlgmr.msra.gmra.mxu1 %v236_v31 }
 0x11a   :  { %547 = vmatpush3.bf16.msra.mxu1 %v595_v30  ;;  %562 = vmatprep.mubr.msk.bf16.mxu1 %vm674_vm1, %v673_v2 }
 0x11b   :  { %548 = vmatprep.subr.bf16.mxu1 %v673_v2 }
 0x11e   :  { %549 = vmatpush3.bf16.msra.mxu1 %v596_v32 }
 0x11f   :  { %550 = vmatprep.subr.bf16.mxu1 %v673_v2 }
 0x122   :  { %551 = vmatpush3.bf16.msra.mxu1 %v597_v33 }
 0x123   :  { %552 = vmatprep.subr.bf16.mxu1 %v673_v2 }
 0x126   :  { %553 = vmatpush3.bf16.msra.mxu1 %v598_v34 }
 0x127   :  { %554 = vmatprep.subr.bf16.mxu1 %v673_v2 }
 0x12a   :  { %555 = vmatpush3.bf16.msra.mxu1 %v599_v35 }
 0x12b   :  { %556 = vmatprep.subr.bf16.mxu1 %v673_v2 }
 0x12e   :  { %557 = vmatpush3.bf16.msra.mxu1 %v600_v36 }
 0x12f   :  { %558 = vmatprep.subr.bf16.mxu1 %v673_v2 }
 0x132   :  { %559 = vmatpush3.bf16.msra.mxu1 %v601_v37 }
 0x133   :  { %560 = vmatprep.subr.bf16.mxu1 %v673_v2 }
 0x136   :  { %561 = vmatpush3.bf16.msra.mxu1 %v602_v38 }
 0x1d9   :  { %v325_v39 = vpop.f32.mrf.mxu1 }
 0x1da   :  { %v326_v43 = vadd.f32 %v489_v40, %v325_v39 }
 0x1db   :  { %v544_v41 = vpop.f32.mrf.mxu1 }
 0x1dd   :  { %v328_v42 = vpop.f32.mrf.mxu1 }
 0x1de   :  { %v329_v44 = vadd.f32 %v489_v40, %v328_v42 }
 0x1df   :  { %v545_v45 = vpop.f32.mrf.mxu1 }
 0x1e0   :  { %v349_v46 = vpack.c.bf16 %v329_v44, %v326_v43 }
 0x1e2   :  { %563 = vmatmul.mubr.bf16.vlgmr.msra.gmra.mxu1 %v349_v46 }
 0x2a2   :  { %v438_v54 = vpop.f32.mrf.mxu1 }
 0x2a3   :  { %v439_v55 = vadd.f32 %v498_v52, %v438_v54 }
 0x2a4   :  { %v564_v56 = vpop.f32.mrf.mxu1 }
 0x2a5   :  { %v452_v57 = vmul.f32 %v451_v53, %v439_v55 }
 0x2a6   :  { %v441_v58 = vpop.f32.mrf.mxu1 }
 0x2a7   :  { %v442_v59 = vadd.f32 %v498_v52, %v441_v58  ;;  %454 = vadd.xlane.f32.xlu0 %v452_v57 }
 0x2a8   :  { %v565_v60 = vpop.f32.mrf.mxu1 }
 0x2a9   :  { %v453_v61 = vmul.f32 %v451_v53, %v442_v59 }
 0x2ab   :  { %456 = vadd.xlane.f32.xlu0 %v453_v61 }
 0x330   :  { %v455_v63 = vpop.xlane.xlu0 %454 }
 0x331   :  { %v464_v0 = vadd.f32 %v507_v62, %v455_v63 }
 0x333   :  { %467 = vst.msk [vmem:[%s788_s9] sm:$0xff] %vm466_vm2, %v464_v0 }
 0x334   :  { %v457_v1 = vpop.xlane.xlu0 %456 }
 0x335   :  { %v465_v2 = vadd.f32 %v507_v62, %v457_v1 }
 0x337   :  { %468 = vst.msk [vmem:[%s788_s9 + $0x8] sm:$0xff] %vm466_vm2, %v465_v2 }
 0x338   :  { %473 = vsyncpa [#allocation4], 1 }
 0x339   :  { %474 = vsyncpa [#allocation6], 1 }

</bundles_post_ra>
